<compile_context>
chip_gen: v5e
topology: v5e:2x2
jax: 0.10.0
libtpu: 0.0.40
codegen_flags: <defaults>
</compile_context>

<pallas_src>
import functools

import jax
import jax.numpy as jnp
from jax.experimental import pallas as pl
from jax.experimental.pallas import tpu as pltpu

IN_DIM = 28 * 28          # 784 — full minor dim of x, no K padding needed
HIDDEN = 256
NUM_CLASSES = 10
OUT_PAD = 128             # lane-dense padded logits width


def _round_up(x, m):
    return ((x + m - 1) // m) * m


def _mlp_kernel(x_ref, w1_ref, b1_ref, w2_ref, b2_ref, w3_ref, b3_ref, o_ref):
    # x arrives in f32 straight from HBM (no wrapper-side pad/cast round trip);
    # cast to bf16 in VMEM so all three matmuls run at the bf16 MXU rate while
    # bias add + ReLU stay on the f32 accumulators.
    x = x_ref[...].astype(jnp.bfloat16)                                   # (bb, 784)

    h1 = jnp.dot(x, w1_ref[...], preferred_element_type=jnp.float32)
    h1 = jnp.maximum(h1 + b1_ref[...], 0.0).astype(jnp.bfloat16)          # (bb, 256)

    h2 = jnp.dot(h1, w2_ref[...], preferred_element_type=jnp.float32)
    h2 = jnp.maximum(h2 + b2_ref[...], 0.0).astype(jnp.bfloat16)          # (bb, 256)

    out = jnp.dot(h2, w3_ref[...], preferred_element_type=jnp.float32)
    o_ref[...] = (out + b3_ref[...]).astype(o_ref.dtype)                  # (bb, 128) bf16


def pack_params(params):
    """One-time weight prep (transpose / pad / bf16 cast). Do once, reuse per call."""
    return dict(
        w1=params["w1"].T.astype(jnp.bfloat16),                           # (784, 256)
        w2=params["w2"].T.astype(jnp.bfloat16),                           # (256, 256)
        w3=jnp.pad(params["w3"].T,                                        # (256, 128)
                   ((0, 0), (0, OUT_PAD - NUM_CLASSES))).astype(jnp.bfloat16),
        b1=params["b1"].reshape(1, HIDDEN).astype(jnp.float32),
        b2=params["b2"].reshape(1, HIDDEN).astype(jnp.float32),
        b3=jnp.pad(params["b3"].reshape(1, NUM_CLASSES).astype(jnp.float32),
                   ((0, 0), (0, OUT_PAD - NUM_CLASSES))),
    )


def _pick_block_batch(n, block_batch):
    """Rows per grid step.

    Multiple of 8 (sublane), capped at block_batch; once the batch is big enough
    we force >= 2 grid steps so the "parallel" axis shards across both v7x
    TensorCores.  No padding of N to a tile multiple — the ragged last block is
    handled by the pipeline (masked output store).
    """
    if n <= 256:
        return max(8, _round_up(n, 8))
    bb = min(block_batch, _round_up(pl.cdiv(n, 2), 256))
    return max(256, bb)


@functools.partial(jax.jit, static_argnames=("block_batch",))
def mlp_forward(x_nchw, packed, block_batch=1024):
    """Forward pass.

    x_nchw: (N, 1, 28, 28) float32 (NCHW, like PyTorch)
    packed: output of pack_params(params) (PyTorch-layout params pre-packed once)
    """
    n = x_nchw.shape[0]
    # nn.Flatten: (N, C, H, W) -> (N, C*H*W); free row-major reshape, no copy.
    x = x_nchw.reshape(n, IN_DIM).astype(jnp.float32)

    bb = _pick_block_batch(n, block_batch)
    grid = (pl.cdiv(n, bb),)   # ragged last block: OOB rows masked on store

    # Weights/biases (~0.6 MiB bf16 total) stay whole in VMEM; constant block
    # index => not re-DMAed across grid steps.
    full = lambda shape: pl.BlockSpec(shape, lambda i: (0, 0))

    out = pl.pallas_call(
        _mlp_kernel,
        out_shape=jax.ShapeDtypeStruct((n, OUT_PAD), jnp.bfloat16),
        grid_spec=pltpu.PrefetchScalarGridSpec(
            num_scalar_prefetch=0,
            grid=grid,
            in_specs=[
                pl.BlockSpec((bb, IN_DIM), lambda i: (i, 0)),  # x tile, f32, full 784 lanes
                full((IN_DIM, HIDDEN)),     # w1
                full((1, HIDDEN)),          # b1
                full((HIDDEN, HIDDEN)),     # w2
                full((1, HIDDEN)),          # b2
                full((HIDDEN, OUT_PAD)),    # w3 (lane-padded)
                full((1, OUT_PAD)),         # b3 (lane-padded)
            ],
            out_specs=pl.BlockSpec((bb, OUT_PAD), lambda i: (i, 0)),
        ),
        compiler_params=pltpu.CompilerParams(
            dimension_semantics=("parallel",),
            # Explicit scoped-VMEM budget so bb=1024/2048 is safe on v5e's smaller
            # default limit while staying well under v7x's 64 MiB physical VMEM.
            vmem_limit_bytes=32 * 1024 * 1024,
        ),
    )(x, packed["w1"], packed["b1"], packed["w2"], packed["b2"],
      packed["w3"], packed["b3"])

    # Drop the lane padding on the logits; return f32 like the PyTorch module.
    return out[:, :NUM_CLASSES].astype(jnp.float32)


def init_params(key):
    """Deterministic parameter init mimicking nn.Linear default (Kaiming-uniform-ish)."""
    ks = jax.random.split(key, 6)

    def linear_init(kw, kb, out_dim, in_dim):
        bound = 1.0 / jnp.sqrt(in_dim)
        w = jax.random.uniform(kw, (out_dim, in_dim), jnp.float32, -bound, bound)
        b = jax.random.uniform(kb, (out_dim,), jnp.float32, -bound, bound)
        return w, b

    w1, b1 = linear_init(ks[0], ks[1], HIDDEN, IN_DIM)
    w2, b2 = linear_init(ks[2], ks[3], HIDDEN, HIDDEN)
    w3, b3 = linear_init(ks[4], ks[5], NUM_CLASSES, HIDDEN)
    return dict(w1=w1, b1=b1, w2=w2, b2=b2, w3=w3, b3=b3)


def _reference(x_nchw, params):
    # Pure f32 reference (matches the PyTorch module exactly).
    x = x_nchw.reshape(x_nchw.shape[0], -1)
    h = jnp.maximum(x @ params["w1"].T + params["b1"], 0.0)
    h = jnp.maximum(h @ params["w2"].T + params["b2"], 0.0)
    return h @ params["w3"].T + params["b3"]


if __name__ == "__main__":
    key = jax.random.PRNGKey(0)
    k_x, k_p = jax.random.split(key)

    params = init_params(k_p)
    packed = pack_params(params)

    # Small primary check (matches PyTorch MNIST input layout).
    batch = 8
    x = jax.random.normal(k_x, (batch, 1, 28, 28), jnp.float32)
    out = jax.block_until_ready(mlp_forward(x, packed))
    ref = _reference(x, params)
    assert out.shape == (batch, NUM_CLASSES)
    # bf16 MXU operands / bf16 logits store => ~1e-2 relative error vs f32 reference.
    assert jnp.allclose(out, ref, atol=5e-2, rtol=5e-2), "mismatch vs pure-JAX reference"

    # Sanity check on a ragged, multi-step grid (2 blocks of 256, last one partial).
    batch2 = 300
    x2 = jax.random.normal(k_x, (batch2, 1, 28, 28), jnp.float32)
    out2 = jax.block_until_ready(mlp_forward(x2, packed))
    ref2 = _reference(x2, params)
    assert out2.shape == (batch2, NUM_CLASSES)
    assert jnp.allclose(out2, ref2, atol=5e-2, rtol=5e-2), "ragged-block mismatch"

    print("KERNEL_OK")
</pallas_src>

<mosaic_0001>
module attributes {stable_mosaic.version = 11 : i64} {
  func.func @_mlp_kernel(%arg0: i32, %arg1: memref<8x784xf32, #tpu.memory_space<vmem>>, %arg2: memref<784x256xbf16, #tpu.memory_space<vmem>>, %arg3: memref<1x256xf32, #tpu.memory_space<vmem>>, %arg4: memref<256x256xbf16, #tpu.memory_space<vmem>>, %arg5: memref<1x256xf32, #tpu.memory_space<vmem>>, %arg6: memref<256x128xbf16, #tpu.memory_space<vmem>>, %arg7: memref<1x128xf32, #tpu.memory_space<vmem>>, %arg8: memref<8x128xbf16, #tpu.memory_space<vmem>>) attributes {dimension_semantics = [#tpu.dimension_semantics<parallel>], iteration_bounds = array<i64: 1>, scalar_prefetch = 0 : i64, scratch_operands = 0 : i64, tpu.core_type = #tpu.core_type<tc>, window_params = [{transform_indices = @transform_0, window_bounds = array<i64: 8, 784>}, {pipeline_mode = #tpu.pipeline_mode<synchronous>, transform_indices = @transform_1, window_bounds = array<i64: 784, 256>}, {pipeline_mode = #tpu.pipeline_mode<synchronous>, transform_indices = @transform_2, window_bounds = array<i64: 1, 256>}, {pipeline_mode = #tpu.pipeline_mode<synchronous>, transform_indices = @transform_3, window_bounds = array<i64: 256, 256>}, {pipeline_mode = #tpu.pipeline_mode<synchronous>, transform_indices = @transform_4, window_bounds = array<i64: 1, 256>}, {pipeline_mode = #tpu.pipeline_mode<synchronous>, transform_indices = @transform_5, window_bounds = array<i64: 256, 128>}, {pipeline_mode = #tpu.pipeline_mode<synchronous>, transform_indices = @transform_6, window_bounds = array<i64: 1, 128>}, {transform_indices = @transform_7, window_bounds = array<i64: 8, 128>}]} {
    %c0 = arith.constant 0 : index
    %c0_0 = arith.constant 0 : index
    %0 = vector.load %arg1[%c0, %c0_0] : memref<8x784xf32, #tpu.memory_space<vmem>>, vector<8x784xf32>
    %1 = arith.truncf %0 : vector<8x784xf32> to vector<8x784xbf16>
    %c0_1 = arith.constant 0 : index
    %c0_2 = arith.constant 0 : index
    %2 = vector.load %arg2[%c0_1, %c0_2] : memref<784x256xbf16, #tpu.memory_space<vmem>>, vector<784x256xbf16>
    %cst = arith.constant dense<0.000000e+00> : vector<8x256xf32>
    %3 = tpu.matmul %1, %2, %cst {dimension_numbers = #tpu.dot_dimension_numbers<[1], [0], [0], [1], [0, 0, 1, 1], [], []>} : vector<8x784xbf16>, vector<784x256xbf16>, vector<8x256xf32> -> vector<8x256xf32>
    %c0_3 = arith.constant 0 : index
    %c0_4 = arith.constant 0 : index
    %4 = vector.load %arg3[%c0_3, %c0_4] : memref<1x256xf32, #tpu.memory_space<vmem>>, vector<1x256xf32>
    %5 = vector.broadcast %4 : vector<1x256xf32> to vector<8x256xf32>
    %6 = arith.addf %3, %5 : vector<8x256xf32>
    %cst_5 = arith.constant 0.000000e+00 : f32
    %7 = vector.broadcast %cst_5 : f32 to vector<8x256xf32>
    %8 = arith.maximumf %6, %7 : vector<8x256xf32>
    %9 = arith.truncf %8 : vector<8x256xf32> to vector<8x256xbf16>
    %c0_6 = arith.constant 0 : index
    %c0_7 = arith.constant 0 : index
    %10 = vector.load %arg4[%c0_6, %c0_7] : memref<256x256xbf16, #tpu.memory_space<vmem>>, vector<256x256xbf16>
    %cst_8 = arith.constant dense<0.000000e+00> : vector<8x256xf32>
    %11 = tpu.matmul %9, %10, %cst_8 {dimension_numbers = #tpu.dot_dimension_numbers<[1], [0], [0], [1], [0, 0, 1, 1], [], []>} : vector<8x256xbf16>, vector<256x256xbf16>, vector<8x256xf32> -> vector<8x256xf32>
    %c0_9 = arith.constant 0 : index
    %c0_10 = arith.constant 0 : index
    %12 = vector.load %arg5[%c0_9, %c0_10] : memref<1x256xf32, #tpu.memory_space<vmem>>, vector<1x256xf32>
    %13 = vector.broadcast %12 : vector<1x256xf32> to vector<8x256xf32>
    %14 = arith.addf %11, %13 : vector<8x256xf32>
    %cst_11 = arith.constant 0.000000e+00 : f32
    %15 = vector.broadcast %cst_11 : f32 to vector<8x256xf32>
    %16 = arith.maximumf %14, %15 : vector<8x256xf32>
    %17 = arith.truncf %16 : vector<8x256xf32> to vector<8x256xbf16>
    %c0_12 = arith.constant 0 : index
    %c0_13 = arith.constant 0 : index
    %18 = vector.load %arg6[%c0_12, %c0_13] : memref<256x128xbf16, #tpu.memory_space<vmem>>, vector<256x128xbf16>
    %cst_14 = arith.constant dense<0.000000e+00> : vector<8x128xf32>
    %19 = tpu.matmul %17, %18, %cst_14 {dimension_numbers = #tpu.dot_dimension_numbers<[1], [0], [0], [1], [0, 0, 1, 1], [], []>} : vector<8x256xbf16>, vector<256x128xbf16>, vector<8x128xf32> -> vector<8x128xf32>
    %c0_15 = arith.constant 0 : index
    %c0_16 = arith.constant 0 : index
    %20 = vector.load %arg7[%c0_15, %c0_16] : memref<1x128xf32, #tpu.memory_space<vmem>>, vector<1x128xf32>
    %21 = vector.broadcast %20 : vector<1x128xf32> to vector<8x128xf32>
    %22 = arith.addf %19, %21 : vector<8x128xf32>
    %23 = arith.truncf %22 : vector<8x128xf32> to vector<8x128xbf16>
    %c0_17 = arith.constant 0 : index
    %c0_18 = arith.constant 0 : index
    %24 = vector.load %arg8[%c0_17, %c0_18] : memref<8x128xbf16, #tpu.memory_space<vmem>>, vector<8x128xbf16>
    tpu.vector_store %arg8[%c0_17, %c0_18], %23 {strides = array<i32>} : memref<8x128xbf16, #tpu.memory_space<vmem>>, vector<8x128xbf16>,
    return
  }
  func.func @transform_0(%arg0: i32) -> (i32, i32) {
    %c0_i32 = arith.constant 0 : i32
    %c0_i32_0 = arith.constant 0 : i32
    return %arg0, %c0_i32 : i32, i32
  }
  func.func @transform_1(%arg0: i32) -> (i32, i32) {
    %c0_i32 = arith.constant 0 : i32
    %c0_i32_0 = arith.constant 0 : i32
    %c0_i32_1 = arith.constant 0 : i32
    return %c0_i32, %c0_i32_0 : i32, i32
  }
  func.func @transform_2(%arg0: i32) -> (i32, i32) {
    %c0_i32 = arith.constant 0 : i32
    %c0_i32_0 = arith.constant 0 : i32
    %c0_i32_1 = arith.constant 0 : i32
    return %c0_i32, %c0_i32_0 : i32, i32
  }
  func.func @transform_3(%arg0: i32) -> (i32, i32) {
    %c0_i32 = arith.constant 0 : i32
    %c0_i32_0 = arith.constant 0 : i32
    %c0_i32_1 = arith.constant 0 : i32
    return %c0_i32, %c0_i32_0 : i32, i32
  }
  func.func @transform_4(%arg0: i32) -> (i32, i32) {
    %c0_i32 = arith.constant 0 : i32
    %c0_i32_0 = arith.constant 0 : i32
    %c0_i32_1 = arith.constant 0 : i32
    return %c0_i32, %c0_i32_0 : i32, i32
  }
  func.func @transform_5(%arg0: i32) -> (i32, i32) {
    %c0_i32 = arith.constant 0 : i32
    %c0_i32_0 = arith.constant 0 : i32
    %c0_i32_1 = arith.constant 0 : i32
    return %c0_i32, %c0_i32_0 : i32, i32
  }
  func.func @transform_6(%arg0: i32) -> (i32, i32) {
    %c0_i32 = arith.constant 0 : i32
    %c0_i32_0 = arith.constant 0 : i32
    %c0_i32_1 = arith.constant 0 : i32
    return %c0_i32, %c0_i32_0 : i32, i32
  }
  func.func @transform_7(%arg0: i32) -> (i32, i32) {
    %c0_i32 = arith.constant 0 : i32
    %c0_i32_0 = arith.constant 0 : i32
    return %arg0, %c0_i32 : i32, i32
  }
}

</mosaic_0001>

<bundles_post_ra>
// kernel: mlp_forward.1
= control target key start
LH: loop header
LB: loop body
LE: loop exit
PB: predicated region body
PF: predicated region fallthrough
CT: control target
= control target key end

     0   :  { %12 = vsyncpa [#allocation3], 0  ;;  %s2775_s0 = inlined_call_operand.vmem [shape: f32[8,784], index: 0, kind: input, shape index: {}]   ;;  %s2776_s1 = inlined_call_operand.vmem [shape: bf16[784,256], index: 1, kind: input, shape index: {}]   ;;  %s2777_s2 = inlined_call_operand.vmem [shape: f32[1,256], index: 2, kind: input, shape index: {}]   ;;  %s2778_s3 = inlined_call_operand.hbm [shape: bf16[256,256], index: 3, kind: input, shape index: {}]   ;;  %s2779_s4 = inlined_call_operand.vmem [shape: f32[1,256], index: 4, kind: input, shape index: {}]   ;;  %s2780_s5 = inlined_call_operand.hbm [shape: bf16[256,128], index: 5, kind: input, shape index: {}]   ;;  %s2781_s6 = inlined_call_operand.vmem [shape: f32[1,128], index: 6, kind: input, shape index: {}]   ;;  %s2782_s7 = inlined_call_operand.vmem [shape: bf16[8,128], index: 7, kind: output, shape index: {}]  }
   0x1   :  { %s24_s26 = sshll.u32 %s2778_s3, 4  ;;  %s25_s26 = int_to_ptr.hbm [resolvable:$true] %s24_s26 }
   0x2   :  { %13 = vsyncpa [#allocation5], 0  ;;  %s2068_s27 = smov [#allocation2]   ;;  %s39_s8 = sshll.u32 %s2780_s5, 4  ;;  %s40_s8 = int_to_ptr.hbm [resolvable:$true] %s39_s8 }
   0x3   :  { %s26_s28 = sshll.u32 %s2068_s27, 4  ;;  %s2069_s9 = smov 128   ;;  %s27_s28 = int_to_ptr.vmem [resolvable:$true] %s26_s28 }
   0x4   :  { %s2070_s10 = smov 8   ;;  %s2071_s11 = smov [#allocation4]  }
   0x5   :  { %32 = dma.hbm_to_vmem [thread:$0]  %s25_s26, 4096, %s27_s28, [#allocation3], %s2069_s9, %s2069_s9, %s2070_s10  }
   0x6   :  { %s41_s12 = sshll.u32 %s2071_s11, 4  ;;  %s2072_s13 = smov 64   ;;  %s42_s12 = int_to_ptr.vmem [resolvable:$true] %s41_s12 }
   0x7   :  { %s2073_s14 = smov 4  }
   0x8   :  { %47 = dma.hbm_to_vmem [thread:$0]  %s40_s8, 2048, %s42_s12, [#allocation5], %s2072_s13, %s2072_s13, %s2073_s14  }
   0x9   :  { %2064 = dma.done.wait [#allocation3], 4096  }
   0xa   :  { %2065 = vsyncadd [#allocation3], 4294963200 }
   0xb   :  { %2066 = dma.done.wait [#allocation5], 2048  }
   0xc   :  { %2067 = vsyncadd [#allocation5], 4294965248  ;;  %v1335_v0 = vld [vmem:[%s2776_s1 + $0x70] sm:$0xf]  ;;  %v1878_v1 = vld [vmem:[%s2776_s1 + $0x74] sm:$0xf0] }
   0xd   :  { %v1463_v2 = vld [vmem:[%s2776_s1 + $0x170] sm:$0xf]  ;;  %v1336_v3 = vor.u32 %v1878_v1, %v1335_v0  ;;  %v1910_v4 = vld [vmem:[%s2776_s1 + $0x174] sm:$0xf0]  ;;  %v1327_v11 = vld [vmem:[%s2776_s1 + $0x60] sm:$0xf] }
   0xe   :  { %v1527_v5 = vld [vmem:[%s2776_s1 + $0x1f0] sm:$0xf]  ;;  %v1926_v6 = vld [vmem:[%s2776_s1 + $0x1f4] sm:$0xf0]  ;;  %v1464_v7 = vor.u32 %v1910_v4, %v1463_v2  ;;  %v1876_v13 = vld [vmem:[%s2776_s1 + $0x64] sm:$0xf0] }
   0xf   :  { %v1528_v8 = vor.u32 %v1926_v6, %v1527_v5  ;;  %v1399_v9 = vld [vmem:[%s2776_s1 + $0xf0] sm:$0xf]  ;;  %v1894_v10 = vld [vmem:[%s2776_s1 + $0xf4] sm:$0xf0]  ;;  %671 = vmatpush.bf16.msra.mxu0 %v1336_v3  ;;  %v1455_v14 = vld [vmem:[%s2776_s1 + $0x160] sm:$0xf]  ;;  %v1328_v16 = vor.u32 %v1876_v13, %v1327_v11 }
  0x10   :  { %v1400_v12 = vor.u32 %v1894_v10, %v1399_v9  ;;  %v1908_v15 = vld [vmem:[%s2776_s1 + $0x164] sm:$0xf0]  ;;  %697 = vmatpush.bf16.msra.mxu2 %v1464_v7  ;;  %v1519_v18 = vld [vmem:[%s2776_s1 + $0x1e0] sm:$0xf]  ;;  %v1319_v23 = vld [vmem:[%s2776_s1 + $0x50] sm:$0xf] }
  0x11   :  { %710 = vmatpush.bf16.msra.mxu3 %v1528_v8  ;;  %v1456_v17 = vor.u32 %v1908_v15, %v1455_v14  ;;  %v1924_v19 = vld [vmem:[%s2776_s1 + $0x1e4] sm:$0xf0]  ;;  %v1391_v20 = vld [vmem:[%s2776_s1 + $0xe0] sm:$0xf]  ;;  %v1874_v24 = vld [vmem:[%s2776_s1 + $0x54] sm:$0xf0] }
  0x12   :  { %684 = vmatpush.bf16.msra.mxu1 %v1400_v12  ;;  %v1520_v21 = vor.u32 %v1924_v19, %v1519_v18  ;;  %v1892_v22 = vld [vmem:[%s2776_s1 + $0xe4] sm:$0xf0]  ;;  %v1447_v26 = vld [vmem:[%s2776_s1 + $0x150] sm:$0xf]  ;;  %v1906_v27 = vld [vmem:[%s2776_s1 + $0x154] sm:$0xf0]  ;;  %v1320_v29 = vor.u32 %v1874_v24, %v1319_v23 }
  0x13   :  { %v1392_v25 = vor.u32 %v1892_v22, %v1391_v20  ;;  %v1511_v28 = vld [vmem:[%s2776_s1 + $0x1d0] sm:$0xf]  ;;  %672 = vmatpush.bf16.msra.mxu0 %v1328_v16  ;;  %v1922_v30 = vld [vmem:[%s2776_s1 + $0x1d4] sm:$0xf0]  ;;  %v1448_v33 = vor.u32 %v1906_v27, %v1447_v26  ;;  %v1311_v35 = vld [vmem:[%s2776_s1 + $0x40] sm:$0xf] }
  0x14   :  { %v1383_v31 = vld [vmem:[%s2776_s1 + $0xd0] sm:$0xf]  ;;  %v1890_v32 = vld [vmem:[%s2776_s1 + $0xd4] sm:$0xf0]  ;;  %698 = vmatpush.bf16.msra.mxu2 %v1456_v17  ;;  %v1512_v34 = vor.u32 %v1922_v30, %v1511_v28  ;;  %v1872_v36 = vld [vmem:[%s2776_s1 + $0x44] sm:$0xf0] }
  0x15   :  { %711 = vmatpush.bf16.msra.mxu3 %v1520_v21  ;;  %v1439_v37 = vld [vmem:[%s2776_s1 + $0x140] sm:$0xf]  ;;  %v1384_v38 = vor.u32 %v1890_v32, %v1383_v31  ;;  %v1904_v39 = vld [vmem:[%s2776_s1 + $0x144] sm:$0xf0]  ;;  %v1312_v44 = vor.u32 %v1872_v36, %v1311_v35  ;;  %v1303_v47 = vld [vmem:[%s2776_s1 + $0x30] sm:$0xf] }
  0x16   :  { %685 = vmatpush.bf16.msra.mxu1 %v1392_v25  ;;  %v1503_v40 = vld [vmem:[%s2776_s1 + $0x1c0] sm:$0xf]  ;;  %v1920_v41 = vld [vmem:[%s2776_s1 + $0x1c4] sm:$0xf0]  ;;  %v1440_v45 = vor.u32 %v1904_v39, %v1439_v37  ;;  %v1870_v48 = vld [vmem:[%s2776_s1 + $0x34] sm:$0xf0] }
  0x17   :  { %v1375_v42 = vld [vmem:[%s2776_s1 + $0xc0] sm:$0xf]  ;;  %v1888_v43 = vld [vmem:[%s2776_s1 + $0xc4] sm:$0xf0]  ;;  %673 = vmatpush.bf16.msra.mxu0 %v1320_v29  ;;  %v1504_v46 = vor.u32 %v1920_v41, %v1503_v40  ;;  %v1431_v49 = vld [vmem:[%s2776_s1 + $0x130] sm:$0xf]  ;;  %v1304_v56 = vor.u32 %v1870_v48, %v1303_v47 }
  0x18   :  { %699 = vmatpush.bf16.msra.mxu2 %v1448_v33  ;;  %v1376_v50 = vor.u32 %v1888_v43, %v1375_v42  ;;  %v1902_v51 = vld [vmem:[%s2776_s1 + $0x134] sm:$0xf0]  ;;  %v1495_v52 = vld [vmem:[%s2776_s1 + $0x1b0] sm:$0xf]  ;;  %v1295_v59 = vld [vmem:[%s2776_s1 + $0x20] sm:$0xf] }
  0x19   :  { %712 = vmatpush.bf16.msra.mxu3 %v1512_v34  ;;  %v1918_v53 = vld [vmem:[%s2776_s1 + $0x1b4] sm:$0xf0]  ;;  %v1367_v54 = vld [vmem:[%s2776_s1 + $0xb0] sm:$0xf]  ;;  %v1432_v57 = vor.u32 %v1902_v51, %v1431_v49  ;;  %v1868_v60 = vld [vmem:[%s2776_s1 + $0x24] sm:$0xf0] }
  0x1a   :  { %686 = vmatpush.bf16.msra.mxu1 %v1384_v38  ;;  %v1886_v55 = vld [vmem:[%s2776_s1 + $0xb4] sm:$0xf0]  ;;  %v1496_v58 = vor.u32 %v1918_v53, %v1495_v52  ;;  %v1423_v61 = vld [vmem:[%s2776_s1 + $0x120] sm:$0xf]  ;;  %v1900_v63 = vld [vmem:[%s2776_s1 + $0x124] sm:$0xf0]  ;;  %v1296_v4 = vor.u32 %v1868_v60, %v1295_v59 }
  0x1b   :  { %674 = vmatpush.bf16.msra.mxu0 %v1312_v44  ;;  %v1368_v62 = vor.u32 %v1886_v55, %v1367_v54  ;;  %v1487_v0 = vld [vmem:[%s2776_s1 + $0x1a0] sm:$0xf]  ;;  %v1916_v1 = vld [vmem:[%s2776_s1 + $0x1a4] sm:$0xf0]  ;;  %v1424_v5 = vor.u32 %v1900_v63, %v1423_v61  ;;  %v1287_v7 = vld [vmem:[%s2776_s1 + $0x10] sm:$0xf] }
  0x1c   :  { %700 = vmatpush.bf16.msra.mxu2 %v1440_v45  ;;  %v1359_v2 = vld [vmem:[%s2776_s1 + $0xa0] sm:$0xf]  ;;  %v1884_v3 = vld [vmem:[%s2776_s1 + $0xa4] sm:$0xf0]  ;;  %v1488_v6 = vor.u32 %v1916_v1, %v1487_v0  ;;  %v1866_v8 = vld [vmem:[%s2776_s1 + $0x14] sm:$0xf0] }
  0x1d   :  { %713 = vmatpush.bf16.msra.mxu3 %v1504_v46  ;;  %v1415_v9 = vld [vmem:[%s2776_s1 + $0x110] sm:$0xf]  ;;  %v1360_v10 = vor.u32 %v1884_v3, %v1359_v2  ;;  %v1898_v11 = vld [vmem:[%s2776_s1 + $0x114] sm:$0xf0]  ;;  %v1288_v16 = vor.u32 %v1866_v8, %v1287_v7  ;;  %v1279_v17 = vld [vmem:[%s2776_s1] sm:$0xf] }
  0x1e   :  { %687 = vmatpush.bf16.msra.mxu1 %v1376_v50  ;;  %v1479_v12 = vld [vmem:[%s2776_s1 + $0x190] sm:$0xf]  ;;  %v1914_v13 = vld [vmem:[%s2776_s1 + $0x194] sm:$0xf0]  ;;  %v1864_v18 = vld [vmem:[%s2776_s1 + $0x4] sm:$0xf0]  ;;  %v1416_v20 = vor.u32 %v1898_v11, %v1415_v9 }
  0x1f   :  { %675 = vmatpush.bf16.msra.mxu0 %v1304_v56  ;;  %v1351_v14 = vld [vmem:[%s2776_s1 + $0x90] sm:$0xf]  ;;  %v1882_v15 = vld [vmem:[%s2776_s1 + $0x94] sm:$0xf0]  ;;  %v1407_v19 = vld [vmem:[%s2776_s1 + $0x100] sm:$0xf]  ;;  %v1480_v21 = vor.u32 %v1914_v13, %v1479_v12  ;;  %v1280_v32 = vor.u32 %v1864_v18, %v1279_v17 }
  0x20   :  { %701 = vmatpush.bf16.msra.mxu2 %v1432_v57  ;;  %v1896_v22 = vld [vmem:[%s2776_s1 + $0x104] sm:$0xf0]  ;;  %v1471_v23 = vld [vmem:[%s2776_s1 + $0x180] sm:$0xf]  ;;  %v1352_v25 = vor.u32 %v1882_v15, %v1351_v14  ;;  %v1591_v26 = vld [vmem:[%s2776_s1 + $0x270] sm:$0xf] }
  0x21   :  { %714 = vmatpush.bf16.msra.mxu3 %v1496_v58  ;;  %v1912_v24 = vld [vmem:[%s2776_s1 + $0x184] sm:$0xf0]  ;;  %v1942_v27 = vld [vmem:[%s2776_s1 + $0x274] sm:$0xf0]  ;;  %v1877_v28 = vld [vmem:[%s2776_s1 + $0x74] sm:$0xf]  ;;  %v1408_v36 = vor.u32 %v1896_v22, %v1407_v19 }
  0x22   :  { %688 = vmatpush.bf16.msra.mxu1 %v1368_v62  ;;  %v1337_v29 = vld [vmem:[%s2776_s1 + $0x78] sm:$0xf0]  ;;  %v1343_v30 = vld [vmem:[%s2776_s1 + $0x80] sm:$0xf]  ;;  %v1880_v31 = vld [vmem:[%s2776_s1 + $0x84] sm:$0xf0]  ;;  %v1472_v37 = vor.u32 %v1912_v24, %v1471_v23  ;;  %v1592_v41 = vor.u32 %v1942_v27, %v1591_v26 }
  0x23   :  { %676 = vmatpush.bf16.msra.mxu0 %v1296_v4  ;;  %v61_v33 = vld [vmem:[%s2775_s0 + $0x10] sm:$0xff]  ;;  %v1663_v34 = vld [vmem:[%s2776_s1 + $0x300] sm:$0xf]  ;;  %v1960_v35 = vld [vmem:[%s2776_s1 + $0x304] sm:$0xf0]  ;;  %v1340_v42 = vor.u32 %v1877_v28, %v1337_v29  ;;  %v1344_v46 = vor.u32 %v1880_v31, %v1343_v30  ;;  %vm667_vm0 = vcmask 130048  }
  0x24   :  { %702 = vmatpush.bf16.msra.mxu2 %v1424_v5  ;;  %v1655_v38 = vld [vmem:[%s2776_s1 + $0x2f0] sm:$0xf]  ;;  %v1958_v39 = vld [vmem:[%s2776_s1 + $0x2f4] sm:$0xf0]  ;;  %v1893_v40 = vld [vmem:[%s2776_s1 + $0xf4] sm:$0xf]  ;;  %v1664_v47 = vor.u32 %v1960_v35, %v1663_v34  ;;  %v2360_v51 = vpack.c.bf16 %v61_v33, %v61_v33 }
  0x25   :  { %715 = vmatpush.bf16.msra.mxu3 %v1488_v6  ;;  %v1401_v43 = vld [vmem:[%s2776_s1 + $0xf8] sm:$0xf0]  ;;  %v1583_v44 = vld [vmem:[%s2776_s1 + $0x260] sm:$0xf]  ;;  %v1940_v48 = vld [vmem:[%s2776_s1 + $0x264] sm:$0xf0]  ;;  %v1656_v52 = vor.u32 %v1958_v39, %v1655_v38 }
  0x26   :  { %689 = vmatpush.bf16.msra.mxu1 %v1360_v10  ;;  %v59_v45 = vld [vmem:[%s2775_s0] sm:$0xff]  ;;  %v1329_v50 = vld [vmem:[%s2776_s1 + $0x68] sm:$0xf0]  ;;  %v62_v53 = vld [vmem:[%s2775_s0 + $0x18] sm:$0xff]  ;;  %v1404_v55 = vor.u32 %v1893_v40, %v1401_v43  ;;  %v1584_v59 = vor.u32 %v1940_v48, %v1583_v44 }
  0x27   :  { %677 = vmatpush.bf16.msra.mxu0 %v1288_v16  ;;  %v1875_v49 = vld [vmem:[%s2776_s1 + $0x64] sm:$0xf]  ;;  %v60_v54 = vld [vmem:[%s2775_s0 + $0x8] sm:$0xff]  ;;  %v1647_v56 = vld [vmem:[%s2776_s1 + $0x2e0] sm:$0xf]  ;;  %v2374_v58 = vpack.c.bf16 %v59_v45, %v59_v45  ;;  %v2394_v3 = vpack.c.bf16 %v62_v53, %v62_v53 }
  0x28   :  { %703 = vmatpush.bf16.msra.mxu2 %v1416_v20  ;;  %v1956_v57 = vld [vmem:[%s2776_s1 + $0x2e4] sm:$0xf0]  ;;  %v1332_v60 = vor.u32 %v1875_v49, %v1329_v50  ;;  %v1891_v61 = vld [vmem:[%s2776_s1 + $0xe4] sm:$0xf]  ;;  %v1393_v62 = vld [vmem:[%s2776_s1 + $0xe8] sm:$0xf0]  ;;  %v2396_v4 = vpack.c.bf16 %v60_v54, %v60_v54 }
  0x29   :  { %716 = vmatpush.bf16.msra.mxu3 %v1480_v21  ;;  %v1575_v63 = vld [vmem:[%s2776_s1 + $0x250] sm:$0xf]  ;;  %v1938_v0 = vld [vmem:[%s2776_s1 + $0x254] sm:$0xf0]  ;;  %v1873_v1 = vld [vmem:[%s2776_s1 + $0x54] sm:$0xf]  ;;  %v1648_v5 = vor.u32 %v1956_v57, %v1647_v56  ;;  %v1396_v6 = vor.u32 %v1891_v61, %v1393_v62 }
  0x2a   :  { %690 = vmatpush.bf16.msra.mxu1 %v1352_v25  ;;  %v1321_v2 = vld [vmem:[%s2776_s1 + $0x58] sm:$0xf0]  ;;  %v1639_v7 = vld [vmem:[%s2776_s1 + $0x2d0] sm:$0xf]  ;;  %v1954_v8 = vld [vmem:[%s2776_s1 + $0x2d4] sm:$0xf0]  ;;  %v1576_v9 = vor.u32 %v1938_v0, %v1575_v63 }
  0x2b   :  { %678 = vmatpush.bf16.msra.mxu0 %v1280_v32  ;;  %v1324_v10 = vor.u32 %v1873_v1, %v1321_v2  ;;  %v1889_v11 = vld [vmem:[%s2776_s1 + $0xd4] sm:$0xf]  ;;  %v1385_v12 = vld [vmem:[%s2776_s1 + $0xd8] sm:$0xf0]  ;;  %v1567_v13 = vld [vmem:[%s2776_s1 + $0x240] sm:$0xf]  ;;  %v1640_v17 = vor.u32 %v1954_v8, %v1639_v7 }
  0x2c   :  { %704 = vmatpush.bf16.msra.mxu2 %v1408_v36  ;;  %v1936_v14 = vld [vmem:[%s2776_s1 + $0x244] sm:$0xf0]  ;;  %v1871_v15 = vld [vmem:[%s2776_s1 + $0x44] sm:$0xf]  ;;  %v1313_v16 = vld [vmem:[%s2776_s1 + $0x48] sm:$0xf0]  ;;  %v1388_v18 = vor.u32 %v1889_v11, %v1385_v12 }
  0x2d   :  { %717 = vmatpush.bf16.msra.mxu3 %v1472_v37  ;;  %v1631_v19 = vld [vmem:[%s2776_s1 + $0x2c0] sm:$0xf]  ;;  %v1952_v20 = vld [vmem:[%s2776_s1 + $0x2c4] sm:$0xf0]  ;;  %v1568_v21 = vor.u32 %v1936_v14, %v1567_v13  ;;  %v1316_v22 = vor.u32 %v1871_v15, %v1313_v16  ;;  %v1887_v23 = vld [vmem:[%s2776_s1 + $0xc4] sm:$0xf] }
  0x2e   :  { %691 = vmatpush.bf16.msra.mxu1 %v1344_v46  ;;  %679 = vmatmul.bf16.vlgmr.msra.gmra.mxu0 %v2374_v58  ;;  %v1377_v24 = vld [vmem:[%s2776_s1 + $0xc8] sm:$0xf0]  ;;  %v1559_v25 = vld [vmem:[%s2776_s1 + $0x230] sm:$0xf]  ;;  %v1934_v26 = vld [vmem:[%s2776_s1 + $0x234] sm:$0xf0]  ;;  %v1632_v29 = vor.u32 %v1952_v20, %v1631_v19 }
  0x2f   :  { %723 = vmatpush.bf16.msrb.mxu0 %v1592_v41  ;;  %705 = vmatmul.bf16.vlgmr.msra.gmra.mxu2 %v2360_v51  ;;  %v1869_v27 = vld [vmem:[%s2776_s1 + $0x34] sm:$0xf]  ;;  %v1305_v28 = vld [vmem:[%s2776_s1 + $0x38] sm:$0xf0]  ;;  %v1380_v30 = vor.u32 %v1887_v23, %v1377_v24  ;;  %v1623_v31 = vld [vmem:[%s2776_s1 + $0x2b0] sm:$0xf]  ;;  %v1560_v34 = vor.u32 %v1934_v26, %v1559_v25 }
  0x30   :  { %756 = vmatpush.bf16.msrb.mxu2 %v1664_v47  ;;  %718 = vmatmul.bf16.vlgmr.msra.gmra.mxu3 %v2394_v3  ;;  %v1950_v32 = vld [vmem:[%s2776_s1 + $0x2b4] sm:$0xf0]  ;;  %v65_v33 = vld [vmem:[%s2775_s0 + $0x30] sm:$0xff]  ;;  %v1308_v35 = vor.u32 %v1869_v27, %v1305_v28  ;;  %v1369_v37 = vld [vmem:[%s2776_s1 + $0xb8] sm:$0xf0] }
  0x31   :  { %762 = vmatpush.bf16.msrb.mxu3 %v1340_v42  ;;  %692 = vmatmul.bf16.vlgmr.msra.gmra.mxu1 %v2396_v4  ;;  %v1885_v36 = vld [vmem:[%s2776_s1 + $0xb4] sm:$0xf]  ;;  %v1551_v38 = vld [vmem:[%s2776_s1 + $0x220] sm:$0xf]  ;;  %v1932_v39 = vld [vmem:[%s2776_s1 + $0x224] sm:$0xf0]  ;;  %v1624_v42 = vor.u32 %v1950_v32, %v1623_v31  ;;  %v2477_v43 = vpack.c.bf16 %v65_v33, %v65_v33 }
  0x32   :  { %736 = vmatpush.bf16.msrb.mxu1 %v1656_v52  ;;  %v1867_v40 = vld [vmem:[%s2776_s1 + $0x24] sm:$0xf]  ;;  %v1297_v41 = vld [vmem:[%s2776_s1 + $0x28] sm:$0xf0]  ;;  %v1372_v44 = vor.u32 %v1885_v36, %v1369_v37  ;;  %v1615_v45 = vld [vmem:[%s2776_s1 + $0x2a0] sm:$0xf]  ;;  %v1552_v47 = vor.u32 %v1932_v39, %v1551_v38 }
  0x33   :  { %724 = vmatpush.bf16.msrb.mxu0 %v1584_v59  ;;  %v1948_v46 = vld [vmem:[%s2776_s1 + $0x2a4] sm:$0xf0]  ;;  %v1300_v48 = vor.u32 %v1867_v40, %v1297_v41  ;;  %v1883_v49 = vld [vmem:[%s2776_s1 + $0xa4] sm:$0xf]  ;;  %v1361_v50 = vld [vmem:[%s2776_s1 + $0xa8] sm:$0xf0] }
  0x34   :  { %775 = vmatpush.bf16.msra.mxu2 %v1404_v55  ;;  %v1543_v52 = vld [vmem:[%s2776_s1 + $0x210] sm:$0xf]  ;;  %v1930_v53 = vld [vmem:[%s2776_s1 + $0x214] sm:$0xf0]  ;;  %v1865_v54 = vld [vmem:[%s2776_s1 + $0x14] sm:$0xf]  ;;  %v1616_v56 = vor.u32 %v1948_v46, %v1615_v45  ;;  %v1364_v57 = vor.u32 %v1883_v49, %v1361_v50 }
  0x35   :  { %763 = vmatpush.bf16.msrb.mxu3 %v1332_v60  ;;  %v1289_v55 = vld [vmem:[%s2776_s1 + $0x18] sm:$0xf0]  ;;  %v1607_v59 = vld [vmem:[%s2776_s1 + $0x290] sm:$0xf]  ;;  %v1946_v60 = vld [vmem:[%s2776_s1 + $0x294] sm:$0xf0]  ;;  %v1544_v62 = vor.u32 %v1930_v53, %v1543_v52 }
  0x36   :  { %737 = vmatpush.bf16.msrb.mxu1 %v1648_v5  ;;  %v1881_v61 = vld [vmem:[%s2776_s1 + $0x94] sm:$0xf]  ;;  %v1292_v63 = vor.u32 %v1865_v54, %v1289_v55  ;;  %v1353_v0 = vld [vmem:[%s2776_s1 + $0x98] sm:$0xf0]  ;;  %v1535_v1 = vld [vmem:[%s2776_s1 + $0x200] sm:$0xf]  ;;  %v1608_v8 = vor.u32 %v1946_v60, %v1607_v59 }
  0x37   :  { %725 = vmatpush.bf16.msrb.mxu0 %v1576_v9  ;;  %v1928_v2 = vld [vmem:[%s2776_s1 + $0x204] sm:$0xf0]  ;;  %v1863_v5 = vld [vmem:[%s2776_s1 + $0x4] sm:$0xf]  ;;  %v1909_v7 = vld [vmem:[%s2776_s1 + $0x174] sm:$0xf]  ;;  %v1356_v12 = vor.u32 %v1881_v61, %v1353_v0 }
  0x38   :  { %776 = vmatpush.bf16.msra.mxu2 %v1396_v6  ;;  %v1281_v6 = vld [vmem:[%s2776_s1 + $0x8] sm:$0xf0]  ;;  %v1465_v9 = vld [vmem:[%s2776_s1 + $0x178] sm:$0xf0]  ;;  %v1599_v13 = vld [vmem:[%s2776_s1 + $0x280] sm:$0xf]  ;;  %v1536_v16 = vor.u32 %v1928_v2, %v1535_v1 }
  0x39   :  { %764 = vmatpush.bf16.msrb.mxu3 %v1324_v10  ;;  %v1941_v10 = vld [vmem:[%s2776_s1 + $0x274] sm:$0xf]  ;;  %v1593_v11 = vld [vmem:[%s2776_s1 + $0x278] sm:$0xf0]  ;;  %v1944_v14 = vld [vmem:[%s2776_s1 + $0x284] sm:$0xf0] }
  0x3a   :  { %738 = vmatpush.bf16.msrb.mxu1 %v1640_v17  ;;  %v63_v15 = vld [vmem:[%s2775_s0 + $0x20] sm:$0xff]  ;;  %v1284_v17 = vor.u32 %v1863_v5, %v1281_v6  ;;  %v1345_v19 = vld [vmem:[%s2776_s1 + $0x88] sm:$0xf0]  ;;  %v1925_v20 = vld [vmem:[%s2776_s1 + $0x1f4] sm:$0xf]  ;;  %v1600_v26 = vor.u32 %v1944_v14, %v1599_v13 }
  0x3b   :  { %726 = vmatpush.bf16.msrb.mxu0 %v1568_v21  ;;  %v1468_v21 = vor.u32 %v1909_v7, %v1465_v9  ;;  %v1529_v23 = vld [vmem:[%s2776_s1 + $0x1f8] sm:$0xf0]  ;;  %v1957_v24 = vld [vmem:[%s2776_s1 + $0x2f4] sm:$0xf]  ;;  %v64_v27 = vld [vmem:[%s2775_s0 + $0x28] sm:$0xff] }
  0x3c   :  { %777 = vmatpush.bf16.msra.mxu2 %v1388_v18  ;;  %v1879_v18 = vld [vmem:[%s2776_s1 + $0x84] sm:$0xf]  ;;  %v1657_v25 = vld [vmem:[%s2776_s1 + $0x2f8] sm:$0xf0]  ;;  %v1585_v33 = vld [vmem:[%s2776_s1 + $0x268] sm:$0xf0]  ;;  %v2588_v37 = vpack.c.bf16 %v64_v27, %v64_v27 }
  0x3d   :  { %765 = vmatpush.bf16.msrb.mxu3 %v1316_v22  ;;  %v1596_v22 = vor.u32 %v1941_v10, %v1593_v11  ;;  %v1907_v28 = vld [vmem:[%s2776_s1 + $0x164] sm:$0xf]  ;;  %v1348_v31 = vor.u32 %v1879_v18, %v1345_v19  ;;  %v1521_v39 = vld [vmem:[%s2776_s1 + $0x1e8] sm:$0xf0]  ;;  %v1449_v45 = vld [vmem:[%s2776_s1 + $0x158] sm:$0xf0] }
  0x3e   :  { %739 = vmatpush.bf16.msrb.mxu1 %v1632_v29  ;;  %v1457_v29 = vld [vmem:[%s2776_s1 + $0x168] sm:$0xf0]  ;;  %v1939_v32 = vld [vmem:[%s2776_s1 + $0x264] sm:$0xf]  ;;  %v1937_v46 = vld [vmem:[%s2776_s1 + $0x254] sm:$0xf] }
  0x3f   :  { %727 = vmatpush.bf16.msrb.mxu0 %v1560_v34  ;;  %1669 = vmatmul.msk.bf16.vlgmr.msrb.gmra.mxu2 %vm667_vm0, %v2477_v43  ;;  %v1532_v34 = vor.u32 %v1925_v20, %v1529_v23  ;;  %v1923_v36 = vld [vmem:[%s2776_s1 + $0x1e4] sm:$0xf]  ;;  %v1460_v38 = vor.u32 %v1907_v28, %v1457_v29  ;;  %v1649_v41 = vld [vmem:[%s2776_s1 + $0x2e8] sm:$0xf0]  ;;  %v1921_v50 = vld [vmem:[%s2776_s1 + $0x1d4] sm:$0xf] }
  0x40   :  { %778 = vmatpush.bf16.msra.mxu2 %v1380_v30  ;;  %v2577_v30 = vpack.c.bf16 %v63_v15, %v63_v15  ;;  %v1955_v40 = vld [vmem:[%s2776_s1 + $0x2e4] sm:$0xf]  ;;  %v1513_v53 = vld [vmem:[%s2776_s1 + $0x1d8] sm:$0xf0]  ;;  %v1953_v54 = vld [vmem:[%s2776_s1 + $0x2d4] sm:$0xf] }
  0x41   :  { %766 = vmatpush.bf16.msrb.mxu3 %v1308_v35  ;;  %v1660_v35 = vor.u32 %v1957_v24, %v1657_v25  ;;  %v1652_v49 = vor.u32 %v1955_v40, %v1649_v41  ;;  %v1641_v55 = vld [vmem:[%s2776_s1 + $0x2d8] sm:$0xf0]  ;;  %v1441_v59 = vld [vmem:[%s2776_s1 + $0x148] sm:$0xf0]  ;;  %v1935_v60 = vld [vmem:[%s2776_s1 + $0x244] sm:$0xf] }
  0x42   :  { %740 = vmatpush.bf16.msrb.mxu1 %v1624_v42  ;;  %v1588_v42 = vor.u32 %v1939_v32, %v1585_v33  ;;  %v1569_v61 = vld [vmem:[%s2776_s1 + $0x248] sm:$0xf0]  ;;  %v1919_v0 = vld [vmem:[%s2776_s1 + $0x1c4] sm:$0xf]  ;;  %v1901_v6 = vld [vmem:[%s2776_s1 + $0x134] sm:$0xf] }
  0x43   :  { %728 = vmatpush.bf16.msrb.mxu0 %v1552_v47  ;;  %v1577_v47 = vld [vmem:[%s2776_s1 + $0x258] sm:$0xf0]  ;;  %v1505_v1 = vld [vmem:[%s2776_s1 + $0x1c8] sm:$0xf0]  ;;  %v1951_v2 = vld [vmem:[%s2776_s1 + $0x2c4] sm:$0xf]  ;;  %v1572_v5 = vor.u32 %v1935_v60, %v1569_v61 }
  0x44   :  { %779 = vmatpush.bf16.msra.mxu2 %v1372_v44  ;;  %v1905_v44 = vld [vmem:[%s2776_s1 + $0x154] sm:$0xf]  ;;  %v1433_v7 = vld [vmem:[%s2776_s1 + $0x138] sm:$0xf0]  ;;  %v1508_v10 = vor.u32 %v1919_v0, %v1505_v1  ;;  %v1899_v18 = vld [vmem:[%s2776_s1 + $0x124] sm:$0xf] }
  0x45   :  { %767 = vmatpush.bf16.msrb.mxu3 %v1300_v48  ;;  %v1524_v48 = vor.u32 %v1923_v36, %v1521_v39  ;;  %v1452_v52 = vor.u32 %v1905_v44, %v1449_v45  ;;  %v1561_v9 = vld [vmem:[%s2776_s1 + $0x238] sm:$0xf0]  ;;  %v1436_v13 = vor.u32 %v1901_v6, %v1433_v7  ;;  %v1949_v15 = vld [vmem:[%s2776_s1 + $0x2b4] sm:$0xf]  ;;  %v1425_v19 = vld [vmem:[%s2776_s1 + $0x128] sm:$0xf0] }
  0x46   :  { %741 = vmatpush.bf16.msrb.mxu1 %v1616_v56  ;;  %v1580_v56 = vor.u32 %v1937_v46, %v1577_v47  ;;  %v1497_v14 = vld [vmem:[%s2776_s1 + $0x1b8] sm:$0xf0]  ;;  %v1931_v20 = vld [vmem:[%s2776_s1 + $0x224] sm:$0xf]  ;;  %v1428_v25 = vor.u32 %v1899_v18, %v1425_v19  ;;  %v1617_v28 = vld [vmem:[%s2776_s1 + $0x2a8] sm:$0xf0] }
  0x47   :  { %729 = vmatpush.bf16.msrb.mxu0 %v1544_v62  ;;  %v1516_v62 = vor.u32 %v1921_v50, %v1513_v53  ;;  %v1915_v24 = vld [vmem:[%s2776_s1 + $0x1a4] sm:$0xf]  ;;  %v1417_v32 = vld [vmem:[%s2776_s1 + $0x118] sm:$0xf0]  ;;  %v1929_v33 = vld [vmem:[%s2776_s1 + $0x214] sm:$0xf] }
  0x48   :  { %780 = vmatpush.bf16.msra.mxu2 %v1364_v57  ;;  %v1903_v57 = vld [vmem:[%s2776_s1 + $0x144] sm:$0xf]  ;;  %v1481_v40 = vld [vmem:[%s2776_s1 + $0x198] sm:$0xf0]  ;;  %v1945_v41 = vld [vmem:[%s2776_s1 + $0x294] sm:$0xf] }
  0x49   :  { %768 = vmatpush.bf16.msrb.mxu3 %v1292_v63  ;;  %v1644_v63 = vor.u32 %v1953_v54, %v1641_v55  ;;  %v1947_v27 = vld [vmem:[%s2776_s1 + $0x2a4] sm:$0xf]  ;;  %v1409_v46 = vld [vmem:[%s2776_s1 + $0x108] sm:$0xf0]  ;;  %v1729_v0 = vld [vmem:[#allocation2 + $0x70] sm:$0xf] }
  0x4a   :  { %742 = vmatpush.bf16.msrb.mxu1 %v1608_v8  ;;  %v1933_v8 = vld [vmem:[%s2776_s1 + $0x234] sm:$0xf]  ;;  %v1620_v36 = vor.u32 %v1947_v27, %v1617_v28  ;;  %v1895_v45 = vld [vmem:[%s2776_s1 + $0x104] sm:$0xf]  ;;  %v1665_v50 = vld [vmem:[%s2776_s1 + $0x308] sm:$0xf0] }
  0x4b   :  { %730 = vmatpush.bf16.msrb.mxu0 %v1536_v16  ;;  %v1625_v16 = vld [vmem:[%s2776_s1 + $0x2b8] sm:$0xf0]  ;;  %v1927_v47 = vld [vmem:[%s2776_s1 + $0x204] sm:$0xf]  ;;  %v1412_v54 = vor.u32 %v1895_v45, %v1409_v46  ;;  %v1601_v60 = vld [vmem:[%s2776_s1 + $0x288] sm:$0xf0] }
  0x4c   :  { %781 = vmatpush.bf16.msra.mxu2 %v1356_v12  ;;  %v1917_v12 = vld [vmem:[%s2776_s1 + $0x1b4] sm:$0xf]  ;;  %v1628_v23 = vor.u32 %v1949_v15, %v1625_v16  ;;  %v1911_v55 = vld [vmem:[%s2776_s1 + $0x184] sm:$0xf]  ;;  %v1721_v6 = vld [vmem:[#allocation2 + $0x60] sm:$0xf] }
  0x4d   :  { %769 = vmatpush.bf16.msrb.mxu3 %v1284_v17  ;;  %v1564_v17 = vor.u32 %v1933_v8, %v1561_v9  ;;  %v1974_v7 = vld [vmem:[#allocation2 + $0x64] sm:$0xf0]  ;;  %v1973_v8 = vld [vmem:[#allocation2 + $0x64] sm:$0xf]  ;;  %v1707_v16 = vld [vmem:[#allocation2 + $0x48] sm:$0xf0] }
  0x4e   :  { %743 = vmatpush.bf16.msrb.mxu1 %v1600_v26  ;;  %731 = vmatmul.bf16.vlgmr.msrb.gmra.mxu0 %v2577_v30  ;;  %v1489_v26 = vld [vmem:[%s2776_s1 + $0x1a8] sm:$0xf0]  ;;  %v1969_v15 = vld [vmem:[#allocation2 + $0x44] sm:$0xf]  ;;  %v1697_v19 = vld [vmem:[#allocation2 + $0x30] sm:$0xf] }
  0x4f   :  { %788 = vmatpush.bf16.msra.mxu0 %v1468_v21  ;;  %v1553_v21 = vld [vmem:[%s2776_s1 + $0x228] sm:$0xf0]  ;;  %v1710_v18 = vor.u32 %v1969_v15, %v1707_v16  ;;  %v1965_v27 = vld [vmem:[#allocation2 + $0x24] sm:$0xf] }
  0x50   :  { %782 = vmatpush.bf16.msra.mxu2 %v1348_v31  ;;  %770 = vmatmul.bf16.vlgmr.msrb.gmra.mxu3 %v2374_v58  ;;  %v1633_v58 = vld [vmem:[%s2776_s1 + $0x2c8] sm:$0xf0]  ;;  %v1556_v29 = vor.u32 %v1931_v20, %v1553_v21  ;;  %v1897_v31 = vld [vmem:[%s2776_s1 + $0x114] sm:$0xf]  ;;  %v1968_v20 = vld [vmem:[#allocation2 + $0x34] sm:$0xf0] }
  0x51   :  { %814 = vmatpush.bf16.msra.mxu3 %v1596_v22  ;;  %744 = vmatmul.bf16.vlgmr.msrb.gmra.mxu1 %v2588_v37  ;;  %v1636_v11 = vor.u32 %v1951_v2, %v1633_v58  ;;  %v1500_v22 = vor.u32 %v1917_v12, %v1497_v14  ;;  %v1420_v39 = vor.u32 %v1897_v31, %v1417_v32  ;;  %v1975_v2 = vld [vmem:[#allocation2 + $0x74] sm:$0xf]  ;;  %v1731_v58 = vld [vmem:[#allocation2 + $0x78] sm:$0xf0]  ;;  %v1705_v12 = vld [vmem:[#allocation2 + $0x40] sm:$0xf] }
  0x52   :  { %801 = vmatpush.bf16.msra.mxu1 %v1532_v34  ;;  %v1545_v34 = vld [vmem:[%s2776_s1 + $0x218] sm:$0xf0]  ;;  %v1967_v21 = vld [vmem:[#allocation2 + $0x34] sm:$0xf]  ;;  %v1681_v32 = vld [vmem:[#allocation2 + $0x10] sm:$0xf] }
  0x53   :  { %789 = vmatpush.bf16.msra.mxu0 %v1460_v38  ;;  %783 = vmatmul.bf16.vlgmr.msra.gmra.mxu2 %v2396_v4  ;;  %v1444_v4 = vor.u32 %v1903_v57, %v1441_v59  ;;  %v1913_v38 = vld [vmem:[%s2776_s1 + $0x194] sm:$0xf]  ;;  %v1548_v44 = vor.u32 %v1929_v33, %v1545_v34  ;;  %v1943_v59 = vld [vmem:[%s2776_s1 + $0x284] sm:$0xf]  ;;  %v1964_v33 = vld [vmem:[#allocation2 + $0x14] sm:$0xf0] }
  0x54   :  { %827 = vmatpush.bf16.msrb.mxu2 %v1660_v35  ;;  %v1492_v35 = vor.u32 %v1915_v24, %v1489_v26  ;;  %v1966_v26 = vld [vmem:[#allocation2 + $0x24] sm:$0xf0]  ;;  %v1963_v34 = vld [vmem:[#allocation2 + $0x14] sm:$0xf]  ;;  %v1675_v46 = vld [vmem:[#allocation2 + $0x8] sm:$0xf0] }
  0x55   :  { %815 = vmatpush.bf16.msra.mxu3 %v1588_v42  ;;  %v1609_v42 = vld [vmem:[%s2776_s1 + $0x298] sm:$0xf0] }
  0x56   :  { %802 = vmatpush.bf16.msra.mxu1 %v1524_v48  ;;  %v1537_v48 = vld [vmem:[%s2776_s1 + $0x208] sm:$0xf0]  ;;  %v1612_v53 = vor.u32 %v1945_v41, %v1609_v42  ;;  %v1673_v41 = vld [vmem:[#allocation2] sm:$0xf]  ;;  %v1962_v42 = vld [vmem:[#allocation2 + $0x4] sm:$0xf0] }
  0x57   :  { %790 = vmatpush.bf16.msra.mxu0 %v1452_v52  ;;  %v1484_v52 = vor.u32 %v1913_v38, %v1481_v40  ;;  %v1540_v57 = vor.u32 %v1927_v47, %v1537_v48  ;;  %v1674_v45 = vor.u32 %v1962_v42, %v1673_v41 }
  0x58   :  { %828 = vmatpush.bf16.msrb.mxu2 %v1652_v49  ;;  %v1959_v49 = vld [vmem:[%s2776_s1 + $0x304] sm:$0xf] }
  0x59   :  { %816 = vmatpush.bf16.msra.mxu3 %v1580_v56  ;;  %v1473_v56 = vld [vmem:[%s2776_s1 + $0x188] sm:$0xf0]  ;;  %v1668_v61 = vor.u32 %v1959_v49, %v1665_v50  ;;  %v2762_v49 = vld [vmem:[%s2777_s2] sm:$0x3] }
  0x5a   :  { %803 = vmatpush.bf16.msra.mxu1 %v1516_v62  ;;  %v1476_v62 = vor.u32 %v1911_v55, %v1473_v56  ;;  %v1991_v55 = vld [vmem:[#allocation2 + $0xf4] sm:$0xf] }
  0x5b   :  { %791 = vmatpush.bf16.msra.mxu0 %v1444_v4  ;;  %v1976_v4 = vld [vmem:[#allocation2 + $0x74] sm:$0xf0] }
  0x5c   :  { %829 = vmatpush.bf16.msrb.mxu2 %v1644_v63  ;;  %v1604_v63 = vor.u32 %v1943_v59, %v1601_v60  ;;  %v1730_v1 = vor.u32 %v1976_v4, %v1729_v0  ;;  %v1795_v59 = vld [vmem:[#allocation2 + $0xf8] sm:$0xf0]  ;;  %v173_v60 = vperm.slane %v2762_v49, 0  ;;  %v1990_v0 = vld [vmem:[#allocation2 + $0xe4] sm:$0xf0] }
  0x5d   :  { %817 = vmatpush.bf16.msra.mxu3 %v1572_v5  ;;  %v1734_v5 = vor.u32 %v1975_v2, %v1731_v58  ;;  %v1989_v4 = vld [vmem:[#allocation2 + $0xe4] sm:$0xf]  ;;  %v1787_v58 = vld [vmem:[#allocation2 + $0xe8] sm:$0xf0] }
  0x5e   :  { %804 = vmatpush.bf16.msra.mxu1 %v1508_v10  ;;  %v1971_v10 = vld [vmem:[#allocation2 + $0x54] sm:$0xf] }
  0x5f   :  { %792 = vmatpush.bf16.msra.mxu0 %v1436_v13  ;;  %v1970_v13 = vld [vmem:[#allocation2 + $0x44] sm:$0xf0] }
  0x60   :  { %830 = vmatpush.bf16.msrb.mxu2 %v1636_v11  ;;  %v1715_v11 = vld [vmem:[#allocation2 + $0x58] sm:$0xf0] }
  0x61   :  { %818 = vmatpush.bf16.msra.mxu3 %v1564_v17  ;;  %v1718_v14 = vor.u32 %v1971_v10, %v1715_v11  ;;  %v1706_v17 = vor.u32 %v1970_v13, %v1705_v12  ;;  %v1779_v10 = vld [vmem:[#allocation2 + $0xd8] sm:$0xf0]  ;;  %v1769_v12 = vld [vmem:[#allocation2 + $0xc0] sm:$0xf]  ;;  %v1986_v13 = vld [vmem:[#allocation2 + $0xc4] sm:$0xf0] }
  0x62   :  { %805 = vmatpush.bf16.msra.mxu1 %v1500_v22  ;;  %v1699_v22 = vld [vmem:[#allocation2 + $0x38] sm:$0xf0]  ;;  %v1770_v16 = vor.u32 %v1986_v13, %v1769_v12 }
  0x63   :  { %793 = vmatpush.bf16.msra.mxu0 %v1428_v25  ;;  %v1702_v24 = vor.u32 %v1967_v21, %v1699_v22  ;;  %v1689_v25 = vld [vmem:[#allocation2 + $0x20] sm:$0xf]  ;;  %v2000_v12 = vld [vmem:[#allocation4 + $0x38] sm:$0xff] }
  0x64   :  { %831 = vmatpush.bf16.msrb.mxu2 %v1628_v23  ;;  %v1698_v23 = vor.u32 %v1968_v20, %v1697_v19  ;;  %v1690_v28 = vor.u32 %v1966_v26, %v1689_v25  ;;  %v1983_v25 = vld [vmem:[#allocation2 + $0xb4] sm:$0xf]  ;;  %v2008_v13 = vld [vmem:[#allocation4 + $0x78] sm:$0xff] }
  0x65   :  { %819 = vmatpush.bf16.msra.mxu3 %v1556_v29  ;;  %v1691_v29 = vld [vmem:[#allocation2 + $0x28] sm:$0xf0] }
  0x66   :  { %806 = vmatpush.bf16.msra.mxu1 %v1492_v35  ;;  %v1694_v31 = vor.u32 %v1965_v27, %v1691_v29  ;;  %v1682_v35 = vor.u32 %v1964_v33, %v1681_v32  ;;  %v1763_v27 = vld [vmem:[#allocation2 + $0xb8] sm:$0xf0]  ;;  %v1753_v32 = vld [vmem:[#allocation2 + $0xa0] sm:$0xf]  ;;  %v1982_v33 = vld [vmem:[#allocation2 + $0xa4] sm:$0xf0] }
  0x67   :  { %794 = vmatpush.bf16.msra.mxu0 %v1420_v39  ;;  %v1766_v29 = vor.u32 %v1983_v25, %v1763_v27 }
  0x68   :  { %832 = vmatpush.bf16.msrb.mxu2 %v1620_v36  ;;  %v1683_v36 = vld [vmem:[#allocation2 + $0x18] sm:$0xf0] }
  0x69   :  { %820 = vmatpush.bf16.msra.mxu3 %v1548_v44  ;;  %v1686_v39 = vor.u32 %v1963_v34, %v1683_v36  ;;  %v1961_v44 = vld [vmem:[#allocation2 + $0x4] sm:$0xf] }
  0x6a   :  { %807 = vmatpush.bf16.msra.mxu1 %v1484_v52  ;;  %v1678_v47 = vor.u32 %v1961_v44, %v1675_v46  ;;  %v1981_v36 = vld [vmem:[#allocation2 + $0xa4] sm:$0xf]  ;;  %v1980_v46 = vld [vmem:[#allocation2 + $0x94] sm:$0xf0] }
  0x6b   :  { %795 = vmatpush.bf16.msra.mxu0 %v1412_v54  ;;  %v1992_v54 = vld [vmem:[#allocation2 + $0xf4] sm:$0xf0] }
  0x6c   :  { %833 = vmatpush.bf16.msrb.mxu2 %v1612_v53  ;;  %v1793_v53 = vld [vmem:[#allocation2 + $0xf0] sm:$0xf] }
  0x6d   :  { %821 = vmatpush.bf16.msra.mxu3 %v1540_v57  ;;  %v1794_v57 = vor.u32 %v1992_v54, %v1793_v53  ;;  %v1737_v53 = vld [vmem:[#allocation2 + $0x80] sm:$0xf]  ;;  %v1978_v54 = vld [vmem:[#allocation2 + $0x84] sm:$0xf0] }
  0x6e   :  { %808 = vmatpush.bf16.msra.mxu1 %v1476_v62  ;;  %796 = vmatmul.bf16.vlgmr.msra.gmra.mxu0 %v2360_v51  ;;  %v1722_v51 = vor.u32 %v1974_v7, %v1721_v6  ;;  %v1790_v6 = vor.u32 %v1989_v4, %v1787_v58 }
  0x6f   :  { %847 = vmatpush.bf16.msrb.mxu0 %v1668_v61  ;;  %v1798_v61 = vor.u32 %v1991_v55, %v1795_v59  ;;  %v1977_v55 = vld [vmem:[#allocation2 + $0x84] sm:$0xf] }
  0x70   :  { %822 = vmatmul.bf16.vlgmr.msra.gmra.mxu3 %v2577_v30  ;;  %834 = vmatpush.bf16.msrb.mxu2 %v1604_v63  ;;  %v1723_v30 = vld [vmem:[#allocation2 + $0x68] sm:$0xf0]  ;;  %v1785_v63 = vld [vmem:[#allocation2 + $0xe0] sm:$0xf] }
  0x71   :  { %809 = vmatmul.bf16.vlgmr.msra.gmra.mxu1 %v2394_v3  ;;  %v1726_v9 = vor.u32 %v1973_v8, %v1723_v30  ;;  %v1713_v3 = vld [vmem:[#allocation2 + $0x50] sm:$0xf]  ;;  %1068 = vmatpush.bf16.msrb.mxu3 %v1794_v57  ;;  %v1786_v2 = vor.u32 %v1990_v0, %v1785_v63  ;;  %v1739_v57 = vld [vmem:[#allocation2 + $0x88] sm:$0xf0] }
  0x72   :  { %1055 = vmatpush.bf16.msrb.mxu1 %v1730_v1  ;;  %v1777_v30 = vld [vmem:[#allocation2 + $0xd0] sm:$0xf] }
  0x73   :  { %835 = vmatmul.bf16.vlgmr.msrb.gmra.mxu2 %v2588_v37  ;;  %1081 = vmatpush.bf16.msra.mxu0 %v1734_v5  ;;  %v1972_v37 = vld [vmem:[#allocation2 + $0x54] sm:$0xf0] }
  0x74   :  { %1094 = vmatpush.bf16.msra.mxu2 %v1798_v61 }
  0x75   :  { %1069 = vmatpush.bf16.msrb.mxu3 %v1786_v2 }
  0x76   :  { %1056 = vmatpush.bf16.msrb.mxu1 %v1722_v51 }
  0x77   :  { %1082 = vmatpush.bf16.msra.mxu0 %v1726_v9  ;;  %v1988_v9 = vld [vmem:[#allocation2 + $0xd4] sm:$0xf0] }
  0x78   :  { %1095 = vmatpush.bf16.msra.mxu2 %v1790_v6 }
  0x7b   :  { %1083 = vmatpush.bf16.msra.mxu0 %v1718_v14  ;;  %v1985_v14 = vld [vmem:[#allocation2 + $0xc4] sm:$0xf] }
  0x7e   :  { %1670 = vmatmul.msk.bf16.vlgmr.msrb.gmra.mxu0 %vm667_vm0, %v2477_v43  ;;  %v1714_v43 = vor.u32 %v1972_v37, %v1713_v3  ;;  %v1987_v3 = vld [vmem:[#allocation2 + $0xd4] sm:$0xf]  ;;  %v1778_v37 = vor.u32 %v1988_v9, %v1777_v30 }
  0x7f   :  { %1084 = vmatpush.bf16.msra.mxu0 %v1710_v18 }
  0x80   :  { %1057 = vmatpush.bf16.msrb.mxu1 %v1714_v43  ;;  %v1782_v43 = vor.u32 %v1987_v3, %v1779_v10  ;;  %1070 = vmatpush.bf16.msrb.mxu3 %v1778_v37 }
  0x82   :  { %1096 = vmatpush.bf16.msra.mxu2 %v1782_v43 }
  0x83   :  { %1085 = vmatpush.bf16.msra.mxu0 %v1702_v24  ;;  %v1984_v24 = vld [vmem:[#allocation2 + $0xb4] sm:$0xf0] }
  0x84   :  { %1058 = vmatpush.bf16.msrb.mxu1 %v1706_v17  ;;  %v1771_v17 = vld [vmem:[#allocation2 + $0xc8] sm:$0xf0]  ;;  %1071 = vmatpush.bf16.msrb.mxu3 %v1770_v16 }
  0x85   :  { %v1774_v20 = vor.u32 %v1985_v14, %v1771_v17  ;;  %v1999_v14 = vld [vmem:[#allocation4 + $0x30] sm:$0xff]  ;;  %v1998_v16 = vld [vmem:[#allocation4 + $0x28] sm:$0xff] }
  0x86   :  { %v2006_v17 = vld [vmem:[#allocation4 + $0x68] sm:$0xff] }
  0x87   :  { %1086 = vmatpush.bf16.msra.mxu0 %v1694_v31  ;;  %1097 = vmatpush.bf16.msra.mxu2 %v1774_v20  ;;  %v1996_v20 = vld [vmem:[#allocation4 + $0x18] sm:$0xff] }
  0x88   :  { %1059 = vmatpush.bf16.msrb.mxu1 %v1698_v23  ;;  %v1761_v23 = vld [vmem:[#allocation2 + $0xb0] sm:$0xf] }
  0x89   :  { %v1762_v26 = vor.u32 %v1984_v24, %v1761_v23  ;;  %v2003_v23 = vld [vmem:[#allocation4 + $0x50] sm:$0xff] }
  0x8b   :  { %1087 = vmatpush.bf16.msra.mxu0 %v1686_v39  ;;  %1072 = vmatpush.bf16.msrb.mxu3 %v1762_v26 }
  0x8c   :  { %1060 = vmatpush.bf16.msrb.mxu1 %v1690_v28  ;;  %1098 = vmatpush.bf16.msra.mxu2 %v1766_v29  ;;  %v2002_v29 = vld [vmem:[#allocation4 + $0x48] sm:$0xff] }
  0x8f   :  { %1088 = vmatpush.bf16.msra.mxu0 %v1678_v47  ;;  %v1979_v47 = vld [vmem:[#allocation2 + $0x94] sm:$0xf] }
  0x90   :  { %1061 = vmatpush.bf16.msrb.mxu1 %v1682_v35  ;;  %v1754_v35 = vor.u32 %v1982_v33, %v1753_v32  ;;  %v2001_v32 = vld [vmem:[#allocation4 + $0x40] sm:$0xff] }
  0x91   :  { %v889_v33 = vld [vmem:[%s2779_s4] sm:$0x3] }
  0x92   :  { %1073 = vmatpush.bf16.msrb.mxu3 %v1754_v35  ;;  %v892_v35 = vperm.slane %v889_v33, 1 }
  0x94   :  { %1062 = vmatpush.bf16.msrb.mxu1 %v1674_v45  ;;  %v1745_v45 = vld [vmem:[#allocation2 + $0x90] sm:$0xf] }
  0x98   :  { %1243 = vmatpush.bf16.msra.mxu1 %v2000_v12 }
  0x9c   :  { %1244 = vmatpush.bf16.msra.mxu1 %v1999_v14 }
  0xa0   :  { %1245 = vmatpush.bf16.msra.mxu1 %v1998_v16 }
  0xab   :  { %v680_v38 = vpop.f32.mrf.mxu0 }
  0xac   :  { %v681_v1 = vadd.f32 %v680_v38, %v173_v60  ;;  %v1755_v38 = vld [vmem:[#allocation2 + $0xa8] sm:$0xf0]  ;;  %v1742_v60 = vor.u32 %v1977_v55, %v1739_v57 }
  0xad   :  { %v1758_v41 = vor.u32 %v1981_v36, %v1755_v38 }
  0xae   :  { %v693_v40 = vpop.f32.mrf.mxu1 }
  0xaf   :  { %v694_v7 = vadd.f32 %v693_v40, %v681_v1  ;;  %1099 = vmatpush.bf16.msra.mxu2 %v1758_v41 }
  0xb2   :  { %v706_v48 = vpop.f32.mrf.mxu2 }
  0xb3   :  { %v719_v50 = vpop.f32.mrf.mxu3  ;;  %v682_v52 = vpop.f32.mrf.mxu0  ;;  %v707_v51 = vadd.f32 %v706_v48, %v694_v7  ;;  %v1746_v48 = vor.u32 %v1980_v46, %v1745_v45 }
  0xb5   :  { %v720_v11 = vadd.f32 %v719_v50, %v707_v51  ;;  %v1747_v50 = vld [vmem:[#allocation2 + $0x98] sm:$0xf0]  ;;  %1074 = vmatpush.bf16.msrb.mxu3 %v1746_v48 }
  0xb6   :  { %v695_v56 = vpop.f32.mrf.mxu1  ;;  %v1750_v52 = vor.u32 %v1979_v47, %v1747_v50 }
  0xb7   :  { %v1738_v56 = vor.u32 %v1978_v54, %v1737_v53  ;;  %v2015_v53 = vld [vmem:[%s2781_s6] ss:$0 sm:$0xff] }
  0xb8   :  { %1100 = vmatpush.bf16.msra.mxu2 %v1750_v52 }
  0xb9   :  { %1075 = vmatpush.bf16.msrb.mxu3 %v1738_v56 }
  0xba   :  { %v708_v62 = vpop.f32.mrf.mxu2 }
  0xbb   :  { %v721_v5 = vpop.f32.mrf.mxu3  ;;  %v174_v62 = vperm.slane %v2762_v49, 1 }
  0xbc   :  { %1101 = vmatpush.bf16.msra.mxu2 %v1742_v60 }
  0xbd   :  { %1256 = vmatpush.bf16.msra.mxu3 %v2008_v13 }
  0xc2   :  { %v758_v8 = vpop.f32.mrf.mxu2 }
  0xca   :  { %v760_v19 = vpop.f32.mrf.mxu2 }
  0xcb   :  { %v732_v15 = vpop.f32.mrf.mxu0  ;;  %v2005_v19 = vld [vmem:[#allocation4 + $0x60] sm:$0xff] }
  0xcc   :  { %v733_v18 = vadd.f32 %v732_v15, %v720_v11  ;;  %v2007_v15 = vld [vmem:[#allocation4 + $0x70] sm:$0xff] }
  0xcd   :  { %1257 = vmatpush.bf16.msra.mxu3 %v2007_v15 }
  0xce   :  { %v745_v21 = vpop.f32.mrf.mxu1 }
  0xcf   :  { %v746_v22 = vadd.f32 %v745_v21, %v733_v18  ;;  %v1997_v18 = vld [vmem:[#allocation4 + $0x20] sm:$0xff]  ;;  %v2004_v21 = vld [vmem:[#allocation4 + $0x58] sm:$0xff] }
  0xd0   :  { %1246 = vmatpush.bf16.msra.mxu1 %v1997_v18 }
  0xd1   :  { %v759_v28 = vadd.f32 %v758_v8, %v746_v22  ;;  %1258 = vmatpush.bf16.msra.mxu3 %v2006_v17  ;;  %v1995_v22 = vld [vmem:[#allocation4 + $0x10] sm:$0xff] }
  0xd3   :  { %v853_v31 = vmax.f32 %v759_v28, 0.0  ;;  %v734_v34 = vpop.f32.mrf.mxu0  ;;  %v771_v42 = vpop.f32.mrf.mxu3  ;;  %v1994_v28 = vld [vmem:[#allocation4 + $0x8] sm:$0xff] }
  0xd4   :  { %v772_v63 = vadd.f32 %v771_v42, %v174_v62  ;;  %1247 = vmatpush.bf16.msra.mxu1 %v1996_v20  ;;  %v891_v34 = vperm.slane %v889_v33, 0 }
  0xd5   :  { %v855_v39 = vpack.c.bf16 %v853_v31, %v853_v31  ;;  %1259 = vmatpush.bf16.msra.mxu3 %v2005_v19  ;;  %v1993_v31 = vld [vmem:[#allocation4] sm:$0xff] }
  0xd6   :  { %v784_v40 = vpop.f32.mrf.mxu2  ;;  %v747_v44 = vpop.f32.mrf.mxu1 }
  0xd7   :  { %1063 = vmatmul.bf16.vlgmr.msrb.gmra.mxu1 %v855_v39  ;;  %1089 = vmatmul.bf16.vlgmr.msra.gmra.mxu0 %v855_v39  ;;  %v785_v4 = vadd.f32 %v784_v40, %v772_v63 }
  0xd8   :  { %1248 = vmatpush.bf16.msra.mxu1 %v1995_v22 }
  0xd9   :  { %1260 = vmatpush.bf16.msra.mxu3 %v2004_v21 }
  0xdb   :  { %v773_v61 = vpop.f32.mrf.mxu3 }
  0xdc   :  { %1249 = vmatpush.bf16.msra.mxu1 %v1994_v28 }
  0xdd   :  { %1261 = vmatpush.bf16.msra.mxu3 %v2003_v23 }
  0xde   :  { %v786_v59 = vpop.f32.mrf.mxu2 }
  0xe0   :  { %1250 = vmatpush.bf16.msra.mxu1 %v1993_v31 }
  0xe1   :  { %1262 = vmatpush.bf16.msra.mxu3 %v2002_v29 }
  0xe5   :  { %1263 = vmatpush.bf16.msra.mxu3 %v2001_v32 }
  0xeb   :  { %v797_v0 = vpop.f32.mrf.mxu0 }
  0xec   :  { %v798_v2 = vadd.f32 %v797_v0, %v785_v4 }
  0xee   :  { %v810_v1 = vpop.f32.mrf.mxu1 }
  0xef   :  { %v811_v6 = vadd.f32 %v810_v1, %v798_v2 }
  0xf3   :  { %v823_v58 = vpop.f32.mrf.mxu3  ;;  %v799_v5 = vpop.f32.mrf.mxu0 }
  0xf4   :  { %v824_v8 = vadd.f32 %v823_v58, %v811_v6 }
  0xf6   :  { %v836_v7 = vpop.f32.mrf.mxu2  ;;  %v812_v51 = vpop.f32.mrf.mxu1 }
  0xf7   :  { %v837_v30 = vadd.f32 %v836_v7, %v824_v8 }
  0xfb   :  { %v825_v9 = vpop.f32.mrf.mxu3  ;;  %v849_v3 = vpop.f32.mrf.mxu0 }
  0xfc   :  { %v850_v37 = vadd.f32 %v849_v3, %v837_v30 }
  0xfe   :  { %v838_v10 = vpop.f32.mrf.mxu2  ;;  %v854_v43 = vmax.f32 %v850_v37, 0.0 }
 0x100   :  { %v856_v11 = vpack.c.bf16 %v854_v43, %v854_v43 }
 0x102   :  { %1076 = vmatmul.bf16.vlgmr.msrb.gmra.mxu3 %v856_v11  ;;  %1102 = vmatmul.bf16.vlgmr.msra.gmra.mxu2 %v856_v11 }
 0x103   :  { %v851_v49 = vpop.f32.mrf.mxu0 }
 0x154   :  { %v1064_v24 = vpop.f32.mrf.mxu1  ;;  %v1090_v25 = vpop.f32.mrf.mxu0 }
 0x155   :  { %v1065_v36 = vadd.f32 %v1064_v24, %v891_v34  ;;  %v1091_v38 = vadd.f32 %v1090_v25, %v892_v35 }
 0x15c   :  { %v1066_v26 = vpop.f32.mrf.mxu1  ;;  %v1092_v27 = vpop.f32.mrf.mxu0 }
 0x185   :  { %v1077_v39 = vpop.f32.mrf.mxu3  ;;  %v1103_v40 = vpop.f32.mrf.mxu2 }
 0x186   :  { %v1078_v41 = vadd.f32 %v1077_v39, %v1065_v36  ;;  %v1104_v42 = vadd.f32 %v1103_v40, %v1091_v38 }
 0x188   :  { %v1107_v44 = vmax.f32 %v1078_v41, 0.0  ;;  %v1108_v45 = vmax.f32 %v1104_v42, 0.0 }
 0x18a   :  { %v1109_v46 = vpack.c.bf16 %v1107_v44, %v1107_v44  ;;  %v1110_v47 = vpack.c.bf16 %v1108_v45, %v1108_v45 }
 0x18c   :  { %1251 = vmatmul.bf16.vlgmr.msra.gmra.mxu1 %v1109_v46  ;;  %1264 = vmatmul.bf16.vlgmr.msra.gmra.mxu3 %v1110_v47 }
 0x18d   :  { %v1079_v48 = vpop.f32.mrf.mxu3  ;;  %v1105_v50 = vpop.f32.mrf.mxu2 }
 0x209   :  { %v1252_v52 = vpop.f32.mrf.mxu1 }
 0x20a   :  { %v1253_v54 = vadd.f32 %v2015_v53, %v1252_v52 }
 0x20f   :  { %v1265_v55 = vpop.f32.mrf.mxu3 }
 0x210   :  { %v1266_v56 = vadd.f32 %v1265_v55, %v1253_v54 }
 0x211   :  { %v1254_v57 = vpop.f32.mrf.mxu1 }
 0x212   :  { %v1269_v59 = vpack.c.bf16 %v1266_v56, %v1266_v56 }
 0x214   :  { %1270 = vst [vmem:[%s2782_s7] sm:$0xf] %v1269_v59 }
 0x217   :  { %v1267_v60 = vpop.f32.mrf.mxu3 }
 0x218   :  { %1275 = vsyncpa [#allocation3], 1 }
 0x219   :  { %1276 = vsyncpa [#allocation5], 1 }

</bundles_post_ra>
